<compile_context>
chip_gen: v6e
topology: v6e:2x2x1
jax: 0.10.0
libtpu: 0.0.40
codegen_flags: <defaults>
</compile_context>

<pallas_src>
import functools

import jax
import jax.numpy as jnp
from jax import lax
from jax.experimental import pallas as pl
from jax.experimental.pallas import tpu as pltpu

ALPHA, BETA, GAMMA = 0.5, 0.5, 0.5
MARGIN = 1.0
_EPS = 1e-12


# --------------------------------------------------------------------------
# VMEM-aware block picking
# --------------------------------------------------------------------------
def _vmem_capacity_bytes():
    try:
        return int(pltpu.get_tpu_info().vmem_capacity_bytes)
    except Exception:
        return 64 * 1024 * 1024   # conservative fallback (v7x physical VMEM)


def _pick_block(n, target, step, fits=None):
    """Largest block <= target that divides n, is a multiple of `step`, and
    passes the VMEM-budget predicate; falls back to the full dimension
    (always legal for BlockSpec)."""
    b = (min(n, target) // step) * step
    while b >= step:
        if n % b == 0 and (fits is None or fits(b)):
            return b
        b -= step
    return n


def _stats_fits(br, c, d, in_bytes, budget):
    io = 2 * br * (4 + (c + d) * in_bytes)          # double-buffered label/logits/emb tiles
    tmp = br * (2 * c + d) * 4                      # onehot + f32 widened tiles
    scratch = (2 * c * d + c * c + 2 * c + 2 * 128) * 4
    return io + tmp + scratch <= budget


def _pair_fits(b, d, in_bytes, budget):
    io = 2 * b * (16 + 2 * d * in_bytes)            # labels+sq (both forms) + emb tiles, x2 buf
    tmp = 2 * b * d * 4 + 4 * b * b * 4             # f32 widened tiles + (B,B) intermediates
    return io + tmp + 1024 <= budget


# --------------------------------------------------------------------------
# Kernel 1: row-tiled "stats" kernel — prototypes, cross-entropy, assignment
# loss and orthogonality loss, accumulated across row blocks.
# --------------------------------------------------------------------------
def _stats_kernel(lab_ref, logits_ref, emb_ref, out_ref,
                  proto_sum_ref, counts_ref, misc_ref, *, n_total):
    r = pl.program_id(0)

    @pl.when(r == 0)
    def _():
        proto_sum_ref[...] = jnp.zeros_like(proto_sum_ref)
        counts_ref[...] = jnp.zeros_like(counts_ref)
        misc_ref[...] = jnp.zeros_like(misc_ref)

    lab = lab_ref[...]                                   # (BR, 1) int32
    logits = logits_ref[...].astype(jnp.float32)         # (BR, C)
    emb = emb_ref[...].astype(jnp.float32)               # (BR, D)
    br, c = logits.shape

    # In-kernel one-hot (no HBM one-hot traffic).
    class_iota = lax.broadcasted_iota(jnp.int32, (br, c), 1)
    onehot = (lab == class_iota).astype(jnp.float32)     # (BR, C)

    # Per-class embedding sums — contract over the batch dim, no explicit .T.
    proto_sum_ref[...] += lax.dot_general(
        onehot, emb, (((0,), (0,)), ((), ())),
        preferred_element_type=jnp.float32)               # (C, D)
    # Per-class counts — lane-dense sublane reduction (XLU), no 1-col matmul.
    counts_ref[...] += jnp.sum(onehot, axis=0, keepdims=True)   # (1, C)

    # Softmax cross-entropy partial sum + sum ||e_i||^2, packed into one
    # lane-dense (1,128) accumulator (no (1,1) masked partial stores).
    m = jnp.max(logits, axis=1, keepdims=True)
    lse = m + jnp.log(jnp.sum(jnp.exp(logits - m), axis=1, keepdims=True))
    tgt = jnp.sum(onehot * logits, axis=1, keepdims=True)
    ce_part = jnp.sum(lse - tgt)
    sq_part = jnp.sum(emb * emb)

    lane = lax.broadcasted_iota(jnp.int32, (1, 128), 1)
    misc_ref[...] += (jnp.where(lane == 0, ce_part, 0.0)
                      + jnp.where(lane == 1, sq_part, 0.0))

    @pl.when(r == pl.num_programs(0) - 1)
    def _():
        inv_n = 1.0 / n_total
        s = proto_sum_ref[...]                            # (C, D) class sums
        counts_row = counts_ref[...]                      # (1, C)
        misc = misc_ref[...]                              # (1, 128)
        ce_sum = jnp.sum(jnp.where(lane == 0, misc, 0.0))
        sq_sum = jnp.sum(jnp.where(lane == 1, misc, 0.0))

        rn2 = jnp.sum(s * s, axis=1, keepdims=True)       # (C, 1) = counts^2 ||p_c||^2

        # loss1: mean cross-entropy.
        loss1 = ce_sum * inv_n

        # loss2 via the exact identity
        #   sum_i ||e_i - p_{y_i}||^2 = sum_i ||e_i||^2 - sum_c ||s_c||^2 / count_c
        # (counts kept lane-dense; the contraction aligns row/column forms.)
        inv_counts = 1.0 / jnp.maximum(counts_row, 1.0)   # (1, C)
        proto_term = jnp.sum(lax.dot_general(
            inv_counts, rn2, (((1,), (0,)), ((), ())),
            preferred_element_type=jnp.float32))
        loss2 = (sq_sum - proto_term) * inv_n

        # loss4: normalized class *sums* have the same direction as prototypes;
        # absent classes are all-zero rows and drop out. Use the exact diag(g)
        # (robust to the +_EPS in rsqrt) rather than assuming diag == 1.
        s_hat = s * lax.rsqrt(rn2 + _EPS)                 # (C, D), EUP rsqrt
        g = lax.dot_general(s_hat, s_hat, (((1,), (1,)), ((), ())),
                            preferred_element_type=jnp.float32)    # (C, C)
        diag_g = jnp.sum(s_hat * s_hat, axis=1, keepdims=True)     # (C, 1) == diag(g)
        p_cnt = jnp.sum((counts_row > 0.0).astype(jnp.float32))
        denom = jnp.maximum(p_cnt * p_cnt - p_cnt, 1.0)
        loss4 = jnp.maximum(jnp.sum(g * g) - jnp.sum(diag_g * diag_g), 0.0) / denom

        # Pack scalars into one lane-dense (1, 128) output tile.
        out_ref[...] = (jnp.where(lane == 0, loss1, 0.0)
                        + jnp.where(lane == 1, loss2, 0.0)
                        + jnp.where(lane == 2, loss4, 0.0))


# --------------------------------------------------------------------------
# Kernel 2: 2-D tiled pairwise margin contrastive loss (loss3).
# Symmetric: only blocks with j >= i are evaluated; strictly-upper blocks are
# weighted 2x, diagonal blocks mask the self-pair diagonal.
# Row axis "parallel" (megacore on v7x), col axis "arbitrary" (accumulation).
# --------------------------------------------------------------------------
def _pair_kernel(lab_i_ref, lab_j_ref, sq_i_ref, sq_j_ref,
                 emb_i_ref, emb_j_ref, out_ref, *, use_bf16):
    i = pl.program_id(0)
    j = pl.program_id(1)

    @pl.when(j == 0)
    def _():
        out_ref[...] = jnp.zeros_like(out_ref)

    @pl.when(j >= i)   # lower-triangle blocks are mirrors — skip their compute
    def _():
        ei = emb_i_ref[...].astype(jnp.float32)            # (B, D)
        ej = emb_j_ref[...].astype(jnp.float32)            # (B, D)
        b, d_dim = ei.shape

        # Fold the 2x distance factor into the cheaper operand (B*D vs B*B muls).
        fold2 = d_dim <= b
        gj = (ej + ej) if fold2 else ej
        if use_bf16:   # native-rate MXU gram on v6e/v7x (f32 gram is multi-pass)
            gi, gj = ei.astype(jnp.bfloat16), gj.astype(jnp.bfloat16)
        else:
            gi = ei
        gram = lax.dot_general(gi, gj, (((1,), (1,)), ((), ())),
                               preferred_element_type=jnp.float32)   # (B, B)

        sqi = sq_i_ref[...]                                # (B, 1) hoisted ||e||^2
        sqj = sq_j_ref[...]                                # (1, B)
        if fold2:
            d2 = jnp.maximum(sqi + sqj - gram, 0.0)
        else:
            d2 = jnp.maximum(sqi + sqj - 2.0 * gram, 0.0)
        d = jnp.sqrt(d2 + _EPS)
        hinge = jnp.maximum(MARGIN - d, 0.0)
        # Bool select (no float `same` mask, no blend).
        pair = jnp.where(lab_i_ref[...] == lab_j_ref[...], d2, hinge * hinge)

        @pl.when(j > i)
        def _():
            out_ref[...] += 2.0 * jnp.sum(pair)            # block + its mirror

        @pl.when(j == i)
        def _():
            # Diagonal block: drop self-pairs (exactness needed for bf16 gram,
            # harmless for f32). Only (n/b) blocks pay this.
            row = lax.broadcasted_iota(jnp.int32, pair.shape, 0)
            col = lax.broadcasted_iota(jnp.int32, pair.shape, 1)
            out_ref[...] += jnp.sum(jnp.where(row == col, 0.0, pair))


# --------------------------------------------------------------------------
# Wrapper
# --------------------------------------------------------------------------
def combined_loss(logits, embeddings, labels, num_classes,
                  *, row_block=256, pair_block=512, use_bf16_gram=True):
    """Returns (total_loss, loss1, loss2, loss3, loss4) as scalars.

    Inputs are streamed in their native dtype (bf16 welcome); all math is f32
    except (optionally) the pairwise gram matmul, which runs in bf16 on the MXU.
    """
    n, c = logits.shape
    d = embeddings.shape[1]
    assert c == num_classes

    labels_col = labels.astype(jnp.int32).reshape(n, 1)
    labels_row = labels.astype(jnp.int32).reshape(1, n)

    # Hoisted per-row squared norms (tiny fused XLA reduction; no f32 copy of
    # embeddings is materialized).
    sq = jnp.sum(jnp.square(embeddings.astype(jnp.float32)), axis=1)
    sq_col = sq.reshape(n, 1)
    sq_row = sq.reshape(1, n)

    # VMEM budget (generation-aware): raise the scoped limit, size blocks to fit.
    cap = _vmem_capacity_bytes()
    vmem_limit = int(cap * 3 // 4)
    budget = vmem_limit // 2
    in_bytes = max(jnp.dtype(logits.dtype).itemsize,
                   jnp.dtype(embeddings.dtype).itemsize)
    emb_bytes = jnp.dtype(embeddings.dtype).itemsize

    # ---- kernel 1: prototypes + CE + assignment + orthogonal ----
    br = _pick_block(n, row_block, 8,
                     fits=lambda b: _stats_fits(b, c, d, in_bytes, budget))
    gr = n // br
    stats = pl.pallas_call(
        functools.partial(_stats_kernel, n_total=float(n)),
        out_shape=jax.ShapeDtypeStruct((1, 128), jnp.float32),
        grid_spec=pltpu.PrefetchScalarGridSpec(
            num_scalar_prefetch=0,
            grid=(gr,),
            in_specs=[
                pl.BlockSpec((br, 1), lambda r: (r, 0)),
                pl.BlockSpec((br, c), lambda r: (r, 0)),
                pl.BlockSpec((br, d), lambda r: (r, 0)),
            ],
            out_specs=pl.BlockSpec((1, 128), lambda r: (0, 0)),
            scratch_shapes=[
                pltpu.VMEM((c, d), jnp.float32),    # per-class embedding sums
                pltpu.VMEM((1, c), jnp.float32),    # per-class counts (lane-dense)
                pltpu.VMEM((1, 128), jnp.float32),  # lane0: CE sum, lane1: sum ||e||^2
            ]),
        compiler_params=pltpu.CompilerParams(
            dimension_semantics=("arbitrary",),
            vmem_limit_bytes=vmem_limit),
        cost_estimate=pl.CostEstimate(
            flops=int(2 * n * c * d + 2 * c * c * d + 8 * n * c + 2 * n * d),
            transcendentals=int(n * c + n + c),
            bytes_accessed=int(in_bytes * (n * c + n * d) + 4 * (n + c * d + 128))),
    )(labels_col, logits, embeddings)
    loss1 = stats[0, 0]
    loss2 = stats[0, 1]
    loss4 = stats[0, 2]

    # ---- kernel 2: symmetric tiled pairwise contrastive loss ----
    # One block size for rows and columns (needed by the triangular schedule);
    # must be a 128-multiple for the (1, b) lane-dense side inputs, or full n.
    b = _pick_block(n, pair_block, 128,
                    fits=lambda bb: _pair_fits(bb, d, emb_bytes, budget))
    gi = n // b
    partials = pl.pallas_call(
        functools.partial(_pair_kernel, use_bf16=use_bf16_gram),
        out_shape=jax.ShapeDtypeStruct((gi, 128), jnp.float32),
        grid_spec=pltpu.PrefetchScalarGridSpec(
            num_scalar_prefetch=0,
            grid=(gi, gi),
            in_specs=[
                pl.BlockSpec((b, 1), lambda i, j: (i, 0)),   # labels (column form)
                pl.BlockSpec((1, b), lambda i, j: (0, j)),   # labels (row form)
                pl.BlockSpec((b, 1), lambda i, j: (i, 0)),   # ||e||^2 (column form)
                pl.BlockSpec((1, b), lambda i, j: (0, j)),   # ||e||^2 (row form)
                pl.BlockSpec((b, d), lambda i, j: (i, 0)),   # embedding row tile
                pl.BlockSpec((b, d), lambda i, j: (j, 0)),   # embedding col tile
            ],
            out_specs=pl.BlockSpec((1, 128), lambda i, j: (i, 0)),
        ),
        compiler_params=pltpu.CompilerParams(
            dimension_semantics=("parallel", "arbitrary"),
            vmem_limit_bytes=vmem_limit),
        cost_estimate=pl.CostEstimate(
            flops=int(n * n * d + 8 * n * n),          # symmetry ~halves actual work
            transcendentals=int(n * n // 2 + n * n // 2),
            bytes_accessed=int(emb_bytes * (n * d + gi * n * d)   # col tiles re-stream gi times
                               + 4 * 4 * n + 4 * gi * 128)),
    )(labels_col, labels_row, sq_col, sq_row, embeddings, embeddings)
    loss3 = jnp.sum(partials[:, 0]) / float(max(n * (n - 1), 1))

    total = loss1 + ALPHA * loss2 + BETA * loss3 + GAMMA * loss4
    return total, loss1, loss2, loss3, loss4


# --------------------------------------------------------------------------
# Pure-JAX reference (canonical formulation) for correctness checking.
# --------------------------------------------------------------------------
def combined_loss_ref(logits, embeddings, labels, num_classes):
    logits = logits.astype(jnp.float32)
    embeddings = embeddings.astype(jnp.float32)
    onehot = jax.nn.one_hot(labels, num_classes, dtype=jnp.float32)
    counts = jnp.sum(onehot, axis=0)
    protos = (onehot.T @ embeddings) / jnp.maximum(counts, 1.0)[:, None]
    present = (counts > 0).astype(jnp.float32)

    lse = jax.scipy.special.logsumexp(logits, axis=1)
    loss1 = jnp.mean(lse - jnp.sum(onehot * logits, axis=1))

    own = onehot @ protos
    loss2 = jnp.mean(jnp.sum((embeddings - own) ** 2, axis=1))

    sq = jnp.sum(embeddings ** 2, axis=1)
    d2 = jnp.maximum(sq[:, None] + sq[None, :] - 2.0 * embeddings @ embeddings.T, 0.0)
    d = jnp.sqrt(d2 + _EPS)
    same = onehot @ onehot.T
    n = logits.shape[0]
    offdiag = 1.0 - jnp.eye(n)
    pair = same * d2 + (1.0 - same) * jnp.maximum(MARGIN - d, 0.0) ** 2
    loss3 = jnp.sum(pair * offdiag) / jnp.maximum(jnp.sum(offdiag), 1.0)

    pn = protos / jnp.sqrt(jnp.sum(protos ** 2, axis=1, keepdims=True) + _EPS)
    g = pn @ pn.T
    cmask = (1.0 - jnp.eye(num_classes)) * present[:, None] * present[None, :]
    loss4 = jnp.sum(g * g * cmask) / jnp.maximum(jnp.sum(cmask), 1.0)

    total = loss1 + ALPHA * loss2 + BETA * loss3 + GAMMA * loss4
    return total, loss1, loss2, loss3, loss4


if __name__ == "__main__":
    N, C, D = 8, 4, 32  # batch, num classes, embedding dim
    key = jax.random.PRNGKey(0)
    k1, k2, k3 = jax.random.split(key, 3)
    logits = jax.random.normal(k1, (N, C), dtype=jnp.float32)
    embeddings = jax.random.normal(k2, (N, D), dtype=jnp.float32)
    labels = jax.random.randint(k3, (N,), 0, C, dtype=jnp.int32)

    refs = combined_loss_ref(logits, embeddings, labels, C)

    # f32-gram path: tight tolerance against the f32 reference.
    outs = jax.block_until_ready(
        combined_loss(logits, embeddings, labels, C, use_bf16_gram=False))
    for got, want in zip(outs, refs):
        assert jnp.allclose(got, want, rtol=1e-4, atol=1e-4), (got, want)

    # Default path (bf16 gram on the MXU): looser tolerance.
    outs_bf = jax.block_until_ready(combined_loss(logits, embeddings, labels, C))
    for got, want in zip(outs_bf, refs):
        assert jnp.allclose(got, want, rtol=3e-2, atol=3e-2), (got, want)

    print("KERNEL_OK")
</pallas_src>

<mosaic_0001>
module attributes {stable_mosaic.version = 11 : i64} {
  func.func @_stats_kernel(%arg0: i32, %arg1: memref<8x1xi32, #tpu.memory_space<vmem>>, %arg2: memref<8x4xf32, #tpu.memory_space<vmem>>, %arg3: memref<8x32xf32, #tpu.memory_space<vmem>>, %arg4: memref<1x128xf32, #tpu.memory_space<vmem>>, %arg5: memref<4x32xf32, #tpu.memory_space<vmem>>, %arg6: memref<1x4xf32, #tpu.memory_space<vmem>>, %arg7: memref<1x128xf32, #tpu.memory_space<vmem>>) attributes {dimension_semantics = [#tpu.dimension_semantics<arbitrary>], iteration_bounds = array<i64: 1>, scalar_prefetch = 0 : i64, scratch_operands = 3 : i64, tpu.core_type = #tpu.core_type<tc>, window_params = [{transform_indices = @transform_0, window_bounds = array<i64: 8, 1>}, {transform_indices = @transform_1, window_bounds = array<i64: 8, 4>}, {transform_indices = @transform_2, window_bounds = array<i64: 8, 32>}, {pipeline_mode = #tpu.pipeline_mode<synchronous>, transform_indices = @transform_3, window_bounds = array<i64: 1, 128>}]} {
    %c0_i32 = arith.constant 0 : i32
    %0 = arith.cmpi eq, %arg0, %c0_i32 : i32
    %1 = arith.extui %0 : i1 to i32
    %c0_i32_0 = arith.constant 0 : i32
    %2 = arith.cmpi ne, %1, %c0_i32_0 : i32
    scf.if %2 {
      %cst_29 = arith.constant 0.000000e+00 : f32
      %60 = vector.broadcast %cst_29 : f32 to vector<4x32xf32>
      %c0_30 = arith.constant 0 : index
      %c0_31 = arith.constant 0 : index
      %61 = vector.load %arg5[%c0_30, %c0_31] : memref<4x32xf32, #tpu.memory_space<vmem>>, vector<4x32xf32>
      tpu.vector_store %arg5[%c0_30, %c0_31], %60 {strides = array<i32>} : memref<4x32xf32, #tpu.memory_space<vmem>>, vector<4x32xf32>,
      %cst_32 = arith.constant 0.000000e+00 : f32
      %62 = vector.broadcast %cst_32 : f32 to vector<1x4xf32>
      %c0_33 = arith.constant 0 : index
      %c0_34 = arith.constant 0 : index
      %63 = vector.load %arg6[%c0_33, %c0_34] : memref<1x4xf32, #tpu.memory_space<vmem>>, vector<1x4xf32>
      tpu.vector_store %arg6[%c0_33, %c0_34], %62 {strides = array<i32>} : memref<1x4xf32, #tpu.memory_space<vmem>>, vector<1x4xf32>,
      %cst_35 = arith.constant 0.000000e+00 : f32
      %64 = vector.broadcast %cst_35 : f32 to vector<1x128xf32>
      %c0_36 = arith.constant 0 : index
      %c0_37 = arith.constant 0 : index
      %65 = vector.load %arg7[%c0_36, %c0_37] : memref<1x128xf32, #tpu.memory_space<vmem>>, vector<1x128xf32>
      tpu.vector_store %arg7[%c0_36, %c0_37], %64 {strides = array<i32>} : memref<1x128xf32, #tpu.memory_space<vmem>>, vector<1x128xf32>,
    } else {
    }
    %c0 = arith.constant 0 : index
    %c0_1 = arith.constant 0 : index
    %3 = vector.load %arg1[%c0, %c0_1] : memref<8x1xi32, #tpu.memory_space<vmem>>, vector<8x1xi32>
    %c0_2 = arith.constant 0 : index
    %c0_3 = arith.constant 0 : index
    %4 = vector.load %arg2[%c0_2, %c0_3] : memref<8x4xf32, #tpu.memory_space<vmem>>, vector<8x4xf32>
    %c0_4 = arith.constant 0 : index
    %c0_5 = arith.constant 0 : index
    %5 = vector.load %arg3[%c0_4, %c0_5] : memref<8x32xf32, #tpu.memory_space<vmem>>, vector<8x32xf32>
    %6 = tpu.iota {dimensions = array<i32: 1>} : vector<8x4xi32>
    %7 = vector.broadcast %3 : vector<8x1xi32> to vector<8x4xi32>
    %8 = arith.cmpi eq, %7, %6 : vector<8x4xi32>
    %9 = arith.extui %8 : vector<8x4xi1> to vector<8x4xi32>
    %10 = arith.sitofp %9 : vector<8x4xi32> to vector<8x4xf32>
    %c0_6 = arith.constant 0 : index
    %c0_7 = arith.constant 0 : index
    %11 = vector.load %arg5[%c0_6, %c0_7] : memref<4x32xf32, #tpu.memory_space<vmem>>, vector<4x32xf32>
    %cst = arith.constant dense<0.000000e+00> : vector<4x32xf32>
    %12 = tpu.matmul %10, %5, %cst {dimension_numbers = #tpu.dot_dimension_numbers<[0], [0], [1], [1], [0, 1, 1, 1], [], []>} : vector<8x4xf32>, vector<8x32xf32>, vector<4x32xf32> -> vector<4x32xf32>
    %13 = arith.addf %11, %12 : vector<4x32xf32>
    %c0_8 = arith.constant 0 : index
    %c0_9 = arith.constant 0 : index
    %14 = vector.load %arg5[%c0_8, %c0_9] : memref<4x32xf32, #tpu.memory_space<vmem>>, vector<4x32xf32>
    tpu.vector_store %arg5[%c0_8, %c0_9], %13 {strides = array<i32>} : memref<4x32xf32, #tpu.memory_space<vmem>>, vector<4x32xf32>,
    %c0_10 = arith.constant 0 : index
    %c0_11 = arith.constant 0 : index
    %15 = vector.load %arg6[%c0_10, %c0_11] : memref<1x4xf32, #tpu.memory_space<vmem>>, vector<1x4xf32>
    %cst_12 = arith.constant dense<0.000000e+00> : vector<4xf32>
    %16 = vector.multi_reduction <add>, %10, %cst_12 [0] : vector<8x4xf32> to vector<4xf32>
    %17 = vector.shape_cast %16 : vector<4xf32> to vector<1x4xf32>
    %18 = arith.addf %15, %17 : vector<1x4xf32>
    %c0_13 = arith.constant 0 : index
    %c0_14 = arith.constant 0 : index
    %19 = vector.load %arg6[%c0_13, %c0_14] : memref<1x4xf32, #tpu.memory_space<vmem>>, vector<1x4xf32>
    tpu.vector_store %arg6[%c0_13, %c0_14], %18 {strides = array<i32>} : memref<1x4xf32, #tpu.memory_space<vmem>>, vector<1x4xf32>,
    %cst_15 = arith.constant dense<0xFF800000> : vector<8xf32>
    %20 = vector.multi_reduction <maximumf>, %4, %cst_15 [1] : vector<8x4xf32> to vector<8xf32>
    %21 = vector.shape_cast %20 : vector<8xf32> to vector<8x1xf32>
    %22 = vector.broadcast %21 : vector<8x1xf32> to vector<8x4xf32>
    %23 = arith.subf %4, %22 : vector<8x4xf32>
    %24 = math.exp %23 : vector<8x4xf32>
    %cst_16 = arith.constant dense<0.000000e+00> : vector<8xf32>
    %25 = vector.multi_reduction <add>, %24, %cst_16 [1] : vector<8x4xf32> to vector<8xf32>
    %26 = vector.shape_cast %25 : vector<8xf32> to vector<8x1xf32>
    %27 = math.log %26 : vector<8x1xf32>
    %28 = arith.addf %21, %27 : vector<8x1xf32>
    %29 = arith.mulf %10, %4 : vector<8x4xf32>
    %cst_17 = arith.constant dense<0.000000e+00> : vector<8xf32>
    %30 = vector.multi_reduction <add>, %29, %cst_17 [1] : vector<8x4xf32> to vector<8xf32>
    %31 = vector.shape_cast %30 : vector<8xf32> to vector<8x1xf32>
    %32 = arith.subf %28, %31 : vector<8x1xf32>
    %33 = vector.shape_cast %32 : vector<8x1xf32> to vector<1x8x1xf32>
    %cst_18 = arith.constant dense<0.000000e+00> : vector<1xf32>
    %34 = vector.multi_reduction <add>, %33, %cst_18 [1, 2] : vector<1x8x1xf32> to vector<1xf32>
    %35 = vector.shape_cast %34 : vector<1xf32> to vector<1x1x1xf32>
    %36 = vector.extract %35[0, 0, 0] : f32 from vector<1x1x1xf32>
    %37 = arith.mulf %5, %5 : vector<8x32xf32>
    %38 = vector.shape_cast %37 : vector<8x32xf32> to vector<1x8x32xf32>
    %cst_19 = arith.constant dense<0.000000e+00> : vector<1xf32>
    %39 = vector.multi_reduction <add>, %38, %cst_19 [1, 2] : vector<1x8x32xf32> to vector<1xf32>
    %40 = vector.shape_cast %39 : vector<1xf32> to vector<1x1x1xf32>
    %41 = vector.extract %40[0, 0, 0] : f32 from vector<1x1x1xf32>
    %42 = tpu.iota {dimensions = array<i32: 1>} : vector<1x128xi32>
    %c0_20 = arith.constant 0 : index
    %c0_21 = arith.constant 0 : index
    %43 = vector.load %arg7[%c0_20, %c0_21] : memref<1x128xf32, #tpu.memory_space<vmem>>, vector<1x128xf32>
    %c0_i32_22 = arith.constant 0 : i32
    %44 = vector.broadcast %c0_i32_22 : i32 to vector<1x128xi32>
    %45 = arith.cmpi eq, %42, %44 : vector<1x128xi32>
    %cst_23 = arith.constant 0.000000e+00 : f32
    %46 = vector.broadcast %36 : f32 to vector<1x128xf32>
    %47 = vector.broadcast %cst_23 : f32 to vector<1x128xf32>
    %48 = arith.select %45, %46, %47 : vector<1x128xi1>, vector<1x128xf32>
    %c1_i32 = arith.constant 1 : i32
    %49 = vector.broadcast %c1_i32 : i32 to vector<1x128xi32>
    %50 = arith.cmpi eq, %42, %49 : vector<1x128xi32>
    %cst_24 = arith.constant 0.000000e+00 : f32
    %51 = vector.broadcast %41 : f32 to vector<1x128xf32>
    %52 = vector.broadcast %cst_24 : f32 to vector<1x128xf32>
    %53 = arith.select %50, %51, %52 : vector<1x128xi1>, vector<1x128xf32>
    %54 = arith.addf %48, %53 : vector<1x128xf32>
    %55 = arith.addf %43, %54 : vector<1x128xf32>
    %c0_25 = arith.constant 0 : index
    %c0_26 = arith.constant 0 : index
    %56 = vector.load %arg7[%c0_25, %c0_26] : memref<1x128xf32, #tpu.memory_space<vmem>>, vector<1x128xf32>
    tpu.vector_store %arg7[%c0_25, %c0_26], %55 {strides = array<i32>} : memref<1x128xf32, #tpu.memory_space<vmem>>, vector<1x128xf32>,
    %c0_i32_27 = arith.constant 0 : i32
    %57 = arith.cmpi eq, %arg0, %c0_i32_27 : i32
    %58 = arith.extui %57 : i1 to i32
    %c0_i32_28 = arith.constant 0 : i32
    %59 = arith.cmpi ne, %58, %c0_i32_28 : i32
    scf.if %59 {
      %c0_29 = arith.constant 0 : index
      %c0_30 = arith.constant 0 : index
      %60 = vector.load %arg5[%c0_29, %c0_30] : memref<4x32xf32, #tpu.memory_space<vmem>>, vector<4x32xf32>
      %c0_31 = arith.constant 0 : index
      %c0_32 = arith.constant 0 : index
      %61 = vector.load %arg6[%c0_31, %c0_32] : memref<1x4xf32, #tpu.memory_space<vmem>>, vector<1x4xf32>
      %c0_33 = arith.constant 0 : index
      %c0_34 = arith.constant 0 : index
      %62 = vector.load %arg7[%c0_33, %c0_34] : memref<1x128xf32, #tpu.memory_space<vmem>>, vector<1x128xf32>
      %c0_i32_35 = arith.constant 0 : i32
      %63 = vector.broadcast %c0_i32_35 : i32 to vector<1x128xi32>
      %64 = arith.cmpi eq, %42, %63 : vector<1x128xi32>
      %cst_36 = arith.constant 0.000000e+00 : f32
      %65 = vector.broadcast %cst_36 : f32 to vector<1x128xf32>
      %66 = arith.select %64, %62, %65 : vector<1x128xi1>, vector<1x128xf32>
      %67 = vector.shape_cast %66 : vector<1x128xf32> to vector<1x1x128xf32>
      %cst_37 = arith.constant dense<0.000000e+00> : vector<1xf32>
      %68 = vector.multi_reduction <add>, %67, %cst_37 [1, 2] : vector<1x1x128xf32> to vector<1xf32>
      %69 = vector.shape_cast %68 : vector<1xf32> to vector<1x1x1xf32>
      %70 = vector.extract %69[0, 0, 0] : f32 from vector<1x1x1xf32>
      %c1_i32_38 = arith.constant 1 : i32
      %71 = vector.broadcast %c1_i32_38 : i32 to vector<1x128xi32>
      %72 = arith.cmpi eq, %42, %71 : vector<1x128xi32>
      %cst_39 = arith.constant 0.000000e+00 : f32
      %73 = vector.broadcast %cst_39 : f32 to vector<1x128xf32>
      %74 = arith.select %72, %62, %73 : vector<1x128xi1>, vector<1x128xf32>
      %75 = vector.shape_cast %74 : vector<1x128xf32> to vector<1x1x128xf32>
      %cst_40 = arith.constant dense<0.000000e+00> : vector<1xf32>
      %76 = vector.multi_reduction <add>, %75, %cst_40 [1, 2] : vector<1x1x128xf32> to vector<1xf32>
      %77 = vector.shape_cast %76 : vector<1xf32> to vector<1x1x1xf32>
      %78 = vector.extract %77[0, 0, 0] : f32 from vector<1x1x1xf32>
      %79 = arith.mulf %60, %60 : vector<4x32xf32>
      %cst_41 = arith.constant dense<0.000000e+00> : vector<4xf32>
      %80 = vector.multi_reduction <add>, %79, %cst_41 [1] : vector<4x32xf32> to vector<4xf32>
      %81 = vector.shape_cast %80 : vector<4xf32> to vector<4x1xf32>
      %cst_42 = arith.constant 1.250000e-01 : f32
      %82 = arith.mulf %70, %cst_42 : f32
      %cst_43 = arith.constant 1.000000e+00 : f32
      %83 = vector.broadcast %cst_43 : f32 to vector<1x4xf32>
      %84 = arith.maximumf %61, %83 : vector<1x4xf32>
      %cst_44 = arith.constant 1.000000e+00 : f32
      %85 = vector.broadcast %cst_44 : f32 to vector<1x4xf32>
      %86 = arith.divf %85, %84 : vector<1x4xf32>
      %cst_45 = arith.constant dense<0.000000e+00> : vector<1x1xf32>
      %87 = tpu.matmul %86, %81, %cst_45 {dimension_numbers = #tpu.dot_dimension_numbers<[1], [0], [0], [1], [0, 0, 1, 1], [], []>} : vector<1x4xf32>, vector<4x1xf32>, vector<1x1xf32> -> vector<1x1xf32>
      %88 = vector.shape_cast %87 : vector<1x1xf32> to vector<1x1x1xf32>
      %cst_46 = arith.constant dense<0.000000e+00> : vector<1xf32>
      %89 = vector.multi_reduction <add>, %88, %cst_46 [1, 2] : vector<1x1x1xf32> to vector<1xf32>
      %90 = vector.shape_cast %89 : vector<1xf32> to vector<1x1x1xf32>
      %91 = vector.extract %90[0, 0, 0] : f32 from vector<1x1x1xf32>
      %92 = arith.subf %78, %91 : f32
      %cst_47 = arith.constant 1.250000e-01 : f32
      %93 = arith.mulf %92, %cst_47 : f32
      %cst_48 = arith.constant 9.99999996E-13 : f32
      %94 = vector.broadcast %cst_48 : f32 to vector<4x1xf32>
      %95 = arith.addf %81, %94 : vector<4x1xf32>
      %96 = math.rsqrt %95 : vector<4x1xf32>
      %97 = vector.broadcast %96 : vector<4x1xf32> to vector<4x32xf32>
      %98 = arith.mulf %60, %97 : vector<4x32xf32>
      %cst_49 = arith.constant dense<0.000000e+00> : vector<4x4xf32>
      %99 = tpu.matmul %98, %98, %cst_49 {dimension_numbers = #tpu.dot_dimension_numbers<[1], [1], [0], [0], [0, 0, 1, 0], [], []>} : vector<4x32xf32>, vector<4x32xf32>, vector<4x4xf32> -> vector<4x4xf32>
      %100 = arith.mulf %98, %98 : vector<4x32xf32>
      %cst_50 = arith.constant dense<0.000000e+00> : vector<4xf32>
      %101 = vector.multi_reduction <add>, %100, %cst_50 [1] : vector<4x32xf32> to vector<4xf32>
      %102 = vector.shape_cast %101 : vector<4xf32> to vector<4x1xf32>
      %cst_51 = arith.constant 0.000000e+00 : f32
      %103 = vector.broadcast %cst_51 : f32 to vector<1x4xf32>
      %104 = arith.cmpf ogt, %61, %103 : vector<1x4xf32>
      %105 = arith.extui %104 : vector<1x4xi1> to vector<1x4xi32>
      %106 = arith.sitofp %105 : vector<1x4xi32> to vector<1x4xf32>
      %107 = vector.shape_cast %106 : vector<1x4xf32> to vector<1x1x4xf32>
      %cst_52 = arith.constant dense<0.000000e+00> : vector<1xf32>
      %108 = vector.multi_reduction <add>, %107, %cst_52 [1, 2] : vector<1x1x4xf32> to vector<1xf32>
      %109 = vector.shape_cast %108 : vector<1xf32> to vector<1x1x1xf32>
      %110 = vector.extract %109[0, 0, 0] : f32 from vector<1x1x1xf32>
      %111 = arith.mulf %110, %110 : f32
      %112 = arith.subf %111, %110 : f32
      %cst_53 = arith.constant 1.000000e+00 : f32
      %113 = arith.maximumf %112, %cst_53 : f32
      %114 = arith.mulf %99, %99 : vector<4x4xf32>
      %115 = vector.shape_cast %114 : vector<4x4xf32> to vector<1x4x4xf32>
      %cst_54 = arith.constant dense<0.000000e+00> : vector<1xf32>
      %116 = vector.multi_reduction <add>, %115, %cst_54 [1, 2] : vector<1x4x4xf32> to vector<1xf32>
      %117 = vector.shape_cast %116 : vector<1xf32> to vector<1x1x1xf32>
      %118 = vector.extract %117[0, 0, 0] : f32 from vector<1x1x1xf32>
      %119 = arith.mulf %102, %102 : vector<4x1xf32>
      %120 = vector.shape_cast %119 : vector<4x1xf32> to vector<1x4x1xf32>
      %cst_55 = arith.constant dense<0.000000e+00> : vector<1xf32>
      %121 = vector.multi_reduction <add>, %120, %cst_55 [1, 2] : vector<1x4x1xf32> to vector<1xf32>
      %122 = vector.shape_cast %121 : vector<1xf32> to vector<1x1x1xf32>
      %123 = vector.extract %122[0, 0, 0] : f32 from vector<1x1x1xf32>
      %124 = arith.subf %118, %123 : f32
      %cst_56 = arith.constant 0.000000e+00 : f32
      %125 = arith.maximumf %124, %cst_56 : f32
      %126 = arith.divf %125, %113 : f32
      %c0_i32_57 = arith.constant 0 : i32
      %127 = vector.broadcast %c0_i32_57 : i32 to vector<1x128xi32>
      %128 = arith.cmpi eq, %42, %127 : vector<1x128xi32>
      %cst_58 = arith.constant 0.000000e+00 : f32
      %129 = vector.broadcast %82 : f32 to vector<1x128xf32>
      %130 = vector.broadcast %cst_58 : f32 to vector<1x128xf32>
      %131 = arith.select %128, %129, %130 : vector<1x128xi1>, vector<1x128xf32>
      %c1_i32_59 = arith.constant 1 : i32
      %132 = vector.broadcast %c1_i32_59 : i32 to vector<1x128xi32>
      %133 = arith.cmpi eq, %42, %132 : vector<1x128xi32>
      %cst_60 = arith.constant 0.000000e+00 : f32
      %134 = vector.broadcast %93 : f32 to vector<1x128xf32>
      %135 = vector.broadcast %cst_60 : f32 to vector<1x128xf32>
      %136 = arith.select %133, %134, %135 : vector<1x128xi1>, vector<1x128xf32>
      %137 = arith.addf %131, %136 : vector<1x128xf32>
      %c2_i32 = arith.constant 2 : i32
      %138 = vector.broadcast %c2_i32 : i32 to vector<1x128xi32>
      %139 = arith.cmpi eq, %42, %138 : vector<1x128xi32>
      %cst_61 = arith.constant 0.000000e+00 : f32
      %140 = vector.broadcast %126 : f32 to vector<1x128xf32>
      %141 = vector.broadcast %cst_61 : f32 to vector<1x128xf32>
      %142 = arith.select %139, %140, %141 : vector<1x128xi1>, vector<1x128xf32>
      %143 = arith.addf %137, %142 : vector<1x128xf32>
      %c0_62 = arith.constant 0 : index
      %c0_63 = arith.constant 0 : index
      %144 = vector.load %arg4[%c0_62, %c0_63] : memref<1x128xf32, #tpu.memory_space<vmem>>, vector<1x128xf32>
      tpu.vector_store %arg4[%c0_62, %c0_63], %143 {strides = array<i32>} : memref<1x128xf32, #tpu.memory_space<vmem>>, vector<1x128xf32>,
    } else {
    }
    return
  }
  func.func @transform_0(%arg0: i32) -> (i32, i32) {
    %c0_i32 = arith.constant 0 : i32
    %c0_i32_0 = arith.constant 0 : i32
    return %arg0, %c0_i32 : i32, i32
  }
  func.func @transform_1(%arg0: i32) -> (i32, i32) {
    %c0_i32 = arith.constant 0 : i32
    %c0_i32_0 = arith.constant 0 : i32
    return %arg0, %c0_i32 : i32, i32
  }
  func.func @transform_2(%arg0: i32) -> (i32, i32) {
    %c0_i32 = arith.constant 0 : i32
    %c0_i32_0 = arith.constant 0 : i32
    return %arg0, %c0_i32 : i32, i32
  }
  func.func @transform_3(%arg0: i32) -> (i32, i32) {
    %c0_i32 = arith.constant 0 : i32
    %c0_i32_0 = arith.constant 0 : i32
    %c0_i32_1 = arith.constant 0 : i32
    return %c0_i32, %c0_i32_0 : i32, i32
  }
}

</mosaic_0001>

<bundles_post_ra>
// kernel: tpu_custom_call.1
= control target key start
LH: loop header
LB: loop body
LE: loop exit
PB: predicated region body
PF: predicated region fallthrough
CT: control target
= control target key end

     0   :  { %vm146_vm0 = vcmask 31744   ;;  %v560_v2 = vmov 0   ;;  %v561_v4 = vmov 0.0   ;;  %s634_s0 = inlined_call_operand.vmem [shape: s32[8,1], index: 0, kind: input, shape index: {}]   ;;  %s635_s1 = inlined_call_operand.vmem [shape: f32[8,4], index: 1, kind: input, shape index: {}]   ;;  %s636_s2 = inlined_call_operand.vmem [shape: f32[8,32], index: 2, kind: input, shape index: {}]   ;;  %s637_s3 = inlined_call_operand.hbm [shape: f32[1,128], index: 3, kind: output, shape index: {}]  }
   0x1   :  { %v25_v0 = vld [vmem:[%s635_s1] sm:$0xff]  ;;  %527 = vset.pattern.permute.xlu0 %v560_v2  ;;  %23 = vst [vmem:[#allocation4] sm:$0x1] %v561_v4  ;;  %488 = vmatprep.subr.mxu0 %v561_v4 }
   0x2   :  { %v24_v1 = vld [vmem:[%s634_s0] sm:$0xff]  ;;  %v157_v3 = vsel %vm146_vm0, %v25_v0, -inf }
   0x3   :  { %8 = vsyncpa [#allocation6], 0  ;;  %158 = vmax.xlane.f32.xlu1 %v157_v3  ;;  %30 = vperm.xlu0 %527, %v24_v1   ;;  %vm21_vm1 = vcmask 24576   ;;  %v26_v5 = vld [vmem:[%s636_s2] sm:$0xff]  ;;  %vm562_vm2 = vmmov 0   ;;  %v27_v6 = vlaneseq  ;;  %vm19_vm5 = vcmask 257024  }
   0x4   :  { %493 = vmatprep.subr.mxu1 %v561_v4  ;;  %22 = vst.msk [vmem:[#allocation3] sm:$0x1] %vm21_vm1, %v561_v4  ;;  %489 = vmatpush3.msra.mxu0 %v26_v5  ;;  %vm68_vm6 = vcmask 64512   ;;  %vm174_vm7 = vcmask 7168   ;;  %v185_v43 = vmul.f32 %v26_v5, %v26_v5  ;;  %vm186_vm8 = vcmask 261120   ;;  %s563_s26 = smov 1.0  }
   0x5   :  { %490 = vmatprep.mubr.msk.f32.mxu0 %vm562_vm2, %v561_v4  ;;  %495 = vmatprep.mubr.msk.f32.mxu1 %vm562_vm2, %v561_v4  ;;  %v599_v7 = vand.u32 127, %v27_v6  ;;  %20 = vst.msk [vmem:[#allocation2] sm:$0xf] %vm19_vm5, %v561_v4  ;;  %vm247_vm9 = vcmask 1043456   ;;  %vm214_vm12 = vcmask 1040384   ;;  %vm422_vm13 = vcmask 27648  }
   0x6   :  { %498 = vmatprep.subr.mxu0 %v561_v4  ;;  %v187_v45 = vsel %vm186_vm8, %v185_v43, 0.0  ;;  %vm434_vm14 = vcmask 3072   ;;  %s564_s4 = smov 0.0   ;;  %s565_s8 = smov [#allocation5]  }
   0x7   :  { %vm198_vm10 = vcmp.eq.s32.totalorder %v599_v7, 0  ;;  %vm201_vm11 = vcmp.eq.s32.totalorder %v599_v7, 1  ;;  %vm456_vm15 = vcmp.eq.s32.totalorder %v599_v7, 2  ;;  %s467_s9 = sshll.u32 %s565_s8, 4  ;;  %s468_s9 = int_to_ptr.vmem [resolvable:$true] %s467_s9 }
   0x8   :  { %s538_s10 = scalar_lea.vmem %s468_s9, 16  ;;  %s542_s11 = scalar_lea.vmem %s468_s9, 32 }
   0x9   :  { %p539_p0 = scmp.ne.s32.totalorder %s468_s9, %s538_s10  ;;  %p543_p1 = scmp.lt.s32.totalorder %s468_s9, %s468_s9 }
   0xa   :  { %p544_p2 = scmp.lt.s32.totalorder %s542_s11, %s538_s10 }
   0xb   :  { %v145_v16 = vld [vmem:[#allocation3] sm:$0x1] }
   0xc   :  { %v35_v31 = vld [vmem:[#allocation2] sm:$0xf]  ;;  %p545_p3 = por %p544_p2, %p543_p1 }
   0xe   :  { %p546_p4 = pnand %p545_p3, %p539_p0 }
  0x7e   :  { %v31_v8 = vpop.permute.xlu0 %30 }
  0x7f   :  { %vm32_vm3 = vcmp.eq.s32.totalorder %v31_v8, %v599_v7  ;;  %v197_v8 = vld [vmem:[#allocation4] sm:$0x1] }
  0x80   :  { %v475_v9 = vsel %vm32_vm3, 1.0, %v561_v4 }
  0x81   :  { %v147_v10 = vsel %vm146_vm0, %v475_v9, 0.0  ;;  %36 = vxpose.xlu0.b32.start.end [1/1] (short) (narrow) %v475_v9, 8  ;;  %v169_v24 = vmul.f32 %v475_v9, %v25_v0 }
  0x82   :  { %v148_v11 = vrot.slane %v147_v10, 4 }
  0x83   :  { %v170_v25 = vsel %vm146_vm0, %v169_v24, 0.0 }
  0x84   :  { %v149_v12 = vadd.f32 %v148_v11, %v147_v10 }
  0x86   :  { %v150_v13 = vrot.slane %v149_v12, 2 }
  0x88   :  { %v151_v14 = vadd.f32 %v150_v13, %v149_v12 }
  0x8a   :  { %v152_v15 = vrot.slane %v151_v14, 1 }
  0x8c   :  { %v153_v17 = vadd.f32 %v152_v15, %v151_v14  ;;  %v159_v18 = vpop.xlane.xlu1 %158 }
  0x8d   :  { %v160_v19 = vsub.f32 %v25_v0, %v159_v18 }
  0x8e   :  { %v154_v20 = vadd.f32 %v153_v17, %v145_v16 }
  0x8f   :  { %v161_v21 = vmul.f32 1.442695, %v160_v19 }
  0x90   :  { %156 = vst.msk [vmem:[#allocation3] sm:$0x1] %vm21_vm1, %v154_v20 }
  0x91   :  { %528 = vpow2.f32 %v161_v21 }
  0x97   :  { %v211_v26 = vld [vmem:[#allocation3] sm:$0x1] }
  0x98   :  { %vm405_vm4 = vcmp.gt.f32.partialorder %v211_v26, 0.0  ;;  %v241_v46 = vmax.f32 %v211_v26, 1.0 }
  0x99   :  { %v481_v27 = vsel %vm405_vm4, 1.0, %v561_v4 }
  0x9a   :  { %v408_v28 = vsel %vm21_vm1, %v481_v27, 0.0 }
  0x9e   :  { %v529_v22 = vpop.eup %528 }
  0x9f   :  { %v163_v23 = vsel %vm146_vm0, %v529_v22, 0.0 }
  0xa0   :  { %164 = vadd.xlane.f32.xlu1 %v163_v23 }
  0xa4   :  { %171 = vadd.xlane.f32.xlu1 %v170_v25 }
  0xae   :  { %409 = vadd.xlane.f32.xlu0 %v408_v28 }
  0xfd   :  { %v52_v29 = vpop.trf.xlu0 }
  0xfe   :  { %491 = vmatmul.mubr.msk.f32.vlgmr.msra.gmra.mxu0 %vm68_vm6, %v52_v29 }
  0xff   :  { %500 = vmatprep.mubr.msk.f32.mxu0 %vm562_vm2, %v561_v4 }
 0x129   :  { %v165_v30 = vpop.xlane.xlu1 %164 }
 0x12a   :  { %530 = vlog2.f32 %v165_v30 }
 0x12b   :  { %532 = vrcp.f32 %v241_v46 }
 0x12d   :  { %v172_v40 = vpop.xlane.xlu1 %171 }
 0x137   :  { %v531_v34 = vpop.eup %530  ;;  %v410_v25 = vpop.xlane.xlu0 %409 }
 0x138   :  { %v167_v36 = vmul.f32 0.6931472, %v531_v34  ;;  %v533_v48 = vpop.eup %532  ;;  %v411_v26 = vrot.slane %v410_v25, 4 }
 0x13a   :  { %v168_v37 = vadd.f32 %v167_v36, %v159_v18  ;;  %v412_v29 = vadd.f32 %v411_v26, %v410_v25 }
 0x13c   :  { %v173_v41 = vsub.f32 %v168_v37, %v172_v40 }
 0x13e   :  { %v175_v44 = vsel %vm174_vm7, %v173_v41, 0.0 }
 0x1be   :  { %v138_v32 = vpop.f32.mrf.mxu0 }
 0x1bf   :  { %v142_v33 = vadd.f32 %v138_v32, %v35_v31 }
 0x1c0   :  { %v492_v35 = vpop.f32.mrf.mxu0 }
 0x1c1   :  { %144 = vst.msk [vmem:[#allocation2] sm:$0xf] %vm19_vm5, %v142_v33  ;;  %v413_v33 = vrot.slane %v412_v29, 2 }
 0x1c8   :  { %v210_v38 = vld [vmem:[#allocation2] sm:$0xf] }
 0x1c9   :  { %v236_v39 = vmul.f32 %v210_v38, %v210_v38 }
 0x1cb   :  { %v237_v42 = vsel %vm19_vm5, %v236_v39, 0.0 }
 0x1cc   :  { %238 = vadd.xlane.f32.xlu1 %v237_v42 }
 0x1d0   :  { %176 = vadd.xlane.f32.xlu1 %v175_v44 }
 0x1d4   :  { %188 = vadd.xlane.f32.xlu1 %v187_v45 }
 0x255   :  { %v239_v47 = vpop.xlane.xlu1 %238 }
 0x256   :  { %v325_v49 = vadd.f32 1e-12, %v239_v47  ;;  %494 = vmatpush3.msk.msra.mxu1 %vm247_vm9, %v239_v47 }
 0x257   :  { %496 = vmatmul.mubr.msk.f32.vlgmr.msra.gmra.mxu1 %vm146_vm0, %v533_v48 }
 0x258   :  { %534 = vrsqrt.f32 %v325_v49 }
 0x259   :  { %v177_v50 = vpop.xlane.xlu1 %176 }
 0x25a   :  { %v178_v51 = vrot.slane %v177_v50, 4 }
 0x25c   :  { %v179_v52 = vadd.f32 %v178_v51, %v177_v50 }
 0x25d   :  { %v189_v53 = vpop.xlane.xlu1 %188 }
 0x25e   :  { %v180_v54 = vrot.slane %v179_v52, 2  ;;  %v190_v55 = vrot.slane %v189_v53, 4 }
 0x260   :  { %v191_v56 = vadd.f32 %v190_v55, %v189_v53  ;;  %v181_v57 = vadd.f32 %v180_v54, %v179_v52 }
 0x262   :  { %v192_v58 = vrot.slane %v191_v56, 2  ;;  %v182_v59 = vrot.slane %v181_v57, 1 }
 0x264   :  { %v183_v60 = vadd.f32 %v182_v59, %v181_v57  ;;  %v193_v61 = vadd.f32 %v192_v58, %v191_v56 }
 0x265   :  { %v535_v62 = vpop.eup %534 }
 0x266   :  { %503 = vpush %v183_v60  ;;  %v327_v63 = vmul.f32 %v535_v62, %v210_v38  ;;  %v194_v0 = vrot.slane %v193_v61, 1  ;;  %v414_v38 = vadd.f32 %v413_v33, %v412_v29 }
 0x268   :  { %499 = vmatpush3.xpose.msk.msra.mxu0 %vm186_vm8, %v327_v63  ;;  %v195_v1 = vadd.f32 %v194_v0, %v193_v61  ;;  %v401_v2 = vmul.f32 %v327_v63, %v327_v63  ;;  %v415_v44 = vrot.slane %v414_v38, 1 }
 0x26a   :  { %505 = vpush %v195_v1  ;;  %v402_v3 = vsel %vm19_vm5, %v401_v2, 0.0  ;;  %v416_v46 = vadd.f32 %v415_v44, %v414_v38 }
 0x26b   :  { %403 = vadd.xlane.f32.xlu1 %v402_v3  ;;  %501 = vmatmul.mubr.msk.f32.vlgmr.msra.gmra.mxu0 %vm186_vm8, %v327_v63 }
 0x297   :  { %s504_s0 = spop %503 }
 0x298   :  { %v199_v4 = vstv %s504_s0 }
 0x299   :  { %v200_v6 = vsel %vm198_vm10, %v199_v4, 0.0 }
 0x29b   :  { %s506_s2 = spop %505 }
 0x29c   :  { %v202_v5 = vstv %s506_s2 }
 0x29d   :  { %v203_v9 = vsel %vm201_vm11, %v202_v5, 0.0 }
 0x29e   :  { %v204_v10 = vadd.f32 %v203_v9, %v200_v6 }
 0x2a0   :  { %v205_v11 = vadd.f32 %v204_v10, %v197_v8 }
 0x2a2   :  { %206 = vst [vmem:[#allocation4] sm:$0x1] %v205_v11 }
 0x2a9   :  { %v212_v12 = vld [vmem:[#allocation4] sm:$0x1] }
 0x2aa   :  { %v213_v13 = vsel %vm198_vm10, %v212_v12, 0.0  ;;  %v225_v15 = vsel %vm201_vm11, %v212_v12, 0.0 }
 0x2ab   :  { %v215_v14 = vsel %vm214_vm12, %v213_v13, 0.0  ;;  %v226_v16 = vsel %vm214_vm12, %v225_v15, 0.0 }
 0x2ac   :  { %216 = vadd.xlane.f32.xlu1 %v215_v14 }
 0x2b0   :  { %227 = vadd.xlane.f32.xlu1 %v226_v16 }
 0x2f4   :  { %v404_v19 = vpop.xlane.xlu1 %403 }
 0x2f5   :  { %v433_v23 = vmul.f32 %v404_v19, %v404_v19 }
 0x2f7   :  { %v435_v27 = vsel %vm434_vm14, %v433_v23, 0.0 }
 0x317   :  { %v317_v17 = vpop.f32.mrf.mxu1 }
 0x319   :  { %v497_v18 = vpop.f32.mrf.mxu1 }
 0x32b   :  { %v397_v20 = vpop.f32.mrf.mxu0 }
 0x32c   :  { %v421_v21 = vmul.f32 %v397_v20, %v397_v20 }
 0x32d   :  { %v502_v22 = vpop.f32.mrf.mxu0 }
 0x32e   :  { %v423_v24 = vsel %vm422_vm13, %v421_v21, 0.0 }
 0x32f   :  { %424 = vadd.xlane.f32.xlu1 %v423_v24 }
 0x333   :  { %436 = vadd.xlane.f32.xlu1 %v435_v27 }
 0x335   :  { %v217_v28 = vpop.xlane.xlu1 %216 }
 0x336   :  { %v218_v30 = vrot.slane %v217_v28, 4 }
 0x338   :  { %v219_v31 = vadd.f32 %v218_v30, %v217_v28 }
 0x339   :  { %v228_v32 = vpop.xlane.xlu1 %227 }
 0x33a   :  { %v220_v34 = vrot.slane %v219_v31, 2  ;;  %v229_v35 = vrot.slane %v228_v32, 4 }
 0x33c   :  { %v230_v36 = vadd.f32 %v229_v35, %v228_v32  ;;  %v221_v37 = vadd.f32 %v220_v34, %v219_v31 }
 0x33e   :  { %v231_v39 = vrot.slane %v230_v36, 2  ;;  %v222_v40 = vrot.slane %v221_v37, 1 }
 0x340   :  { %v223_v41 = vadd.f32 %v222_v40, %v221_v37  ;;  %v232_v42 = vadd.f32 %v231_v39, %v230_v36 }
 0x342   :  { %507 = vpush %v223_v41  ;;  %v233_v43 = vrot.slane %v232_v42, 1 }
 0x344   :  { %v234_v45 = vadd.f32 %v233_v43, %v232_v42 }
 0x346   :  { %509 = vpush %v234_v45 }
 0x347   :  { %511 = vpush %v317_v17 }
 0x348   :  { %513 = vpush %v416_v46 }
 0x373   :  { %s508_s17 = spop %507 }
 0x374   :  { %s240_s18 = smul.f32 0.125, %s508_s17 }
 0x376   :  { %v451_v47 = vstv %s240_s18 }
 0x377   :  { %s510_s19 = spop %509  ;;  %v452_v49 = vsel %vm198_vm10, %v451_v47, 0.0 }
 0x378   :  { %s512_s20 = spop %511 }
 0x379   :  { %s323_s21 = ssub.f32 %s510_s19, %s512_s20  ;;  %s514_s23 = spop %513 }
 0x37a   :  { %s418_s24 = smul.f32 %s514_s23, %s514_s23 }
 0x37b   :  { %s324_s22 = smul.f32 0.125, %s323_s21 }
 0x37c   :  { %s419_s25 = ssub.f32 %s418_s24, %s514_s23 }
 0x37d   :  { %v453_v48 = vstv %s324_s22 }
 0x37e   :  { %v454_v50 = vsel %vm201_vm11, %v453_v48, 0.0  ;;  %s420_s27 = smax.f32 %s563_s26, %s419_s25 }
 0x37f   :  { %v455_v51 = vadd.f32 %v454_v50, %v452_v49  ;;  %v447_v53 = vstv %s420_s27 }
 0x380   :  { %536 = vrcp.f32 %v447_v53 }
 0x38d   :  { %v537_v3 = vpop.eup %536 }
 0x3b8   :  { %v425_v52 = vpop.xlane.xlu1 %424 }
 0x3b9   :  { %v426_v54 = vrot.slane %v425_v52, 4 }
 0x3bb   :  { %v427_v55 = vadd.f32 %v426_v54, %v425_v52 }
 0x3bc   :  { %v437_v56 = vpop.xlane.xlu1 %436 }
 0x3bd   :  { %v428_v57 = vrot.slane %v427_v55, 2  ;;  %v438_v58 = vrot.slane %v437_v56, 4 }
 0x3bf   :  { %v439_v59 = vadd.f32 %v438_v58, %v437_v56  ;;  %v429_v60 = vadd.f32 %v428_v57, %v427_v55 }
 0x3c1   :  { %v440_v61 = vrot.slane %v439_v59, 2  ;;  %v430_v62 = vrot.slane %v429_v60, 1 }
 0x3c3   :  { %v441_v63 = vadd.f32 %v440_v61, %v439_v59  ;;  %v431_v0 = vadd.f32 %v430_v62, %v429_v60 }
 0x3c5   :  { %515 = vpush %v431_v0  ;;  %v442_v1 = vrot.slane %v441_v63, 1 }
 0x3c7   :  { %v443_v2 = vadd.f32 %v442_v1, %v441_v63 }
 0x3c9   :  { %517 = vpush %v443_v2 }
 0x3ca   :  { %519 = vpush %v537_v3 }
 0x3f6   :  { %s516_s28 = spop %515 }
 0x3fa   :  { %s518_s29 = spop %517 }
 0x3fb   :  { %s445_s30 = ssub.f32 %s516_s28, %s518_s29  ;;  %s520_s6 = spop %519 }
 0x3fd   :  { %s446_s5 = smax.f32 %s564_s4, %s445_s30 }
 0x3fe   :  { %s450_s7 = smul.f32 %s520_s6, %s446_s5 }
 0x400   :  { %v457_v4 = vstv %s450_s7 }
 0x401   :  { %v458_v5 = vsel %vm456_vm15, %v457_v4, 0.0 }
 0x402   :  { %v459_v6 = vadd.f32 %v458_v5, %v455_v51 }
 0x404   :  { %460 = vst [vmem:[#allocation5] sm:$0x1] %v459_v6 }
 0x405   :  { %549 = shalt.err (!%p546_p4)
}
 0x406   :  { %470 = dma.vmem_to_hbm [thread:$0]  %s468_s9, 16, %s637_s3, [#allocation6]  }
 0x407   :  { %558 = dma.done.wait [#allocation6], 16  }
 0x408   :  { %559 = vsyncadd [#allocation6], 4294967280 }
 0x409   :  { %474 = vsyncpa [#allocation6], 1 }

</bundles_post_ra>
